<compile_context>
chip_gen: v6e
topology: v6e:2x2x1
jax: 0.10.0
libtpu: 0.0.40
codegen_flags: <defaults>
</compile_context>

<pallas_src>
import jax
import jax.numpy as jnp
import numpy as np
from jax.experimental import pallas as pl
from jax.experimental.pallas import tpu as pltpu


def _cdiv(a: int, b: int) -> int:
    return -(-a // b)


def _choose_group(R: int, W: int, s1: int, s2: int, itemsize: int,
                  max_e_bytes: int = 4 << 20, max_g: int = 64) -> int:
    """Smallest G such that the flat output row (G*s1*s2*W elems) is a
    128-lane multiple (unmasked vst), G divides R, and the block-diagonal
    selection matrix stays small. Falls back to 1 (masked edge stores)."""
    lane = s1 * s2 * W
    if lane % 128 == 0:
        return 1
    for g in range(2, max_g + 1):
        if R % g:
            continue
        if (g * lane) % 128:
            continue
        if (g * W) * (g * lane) * itemsize > max_e_bytes:
            break  # E only grows with g
        return g
    return 1


def _plan_row_block(Rg: int, in_row_bytes: int, out_row_bytes: int,
                    e_bytes: int, itemsize: int,
                    target_out_bytes: int = 8 << 20):
    """Row-block size, grid length and VMEM limit.

    ~8 MiB of output per grid step (per-step overhead << DMA time on all of
    v5e/v6e/v7x), >= 2 grid steps (v7x dual-TC sharding + pipelining), even
    step count when possible, tbr a multiple of the dtype's sublane packing,
    and the double-buffered working set budgeted against physical VMEM."""
    sub = max(8, 32 // itemsize)  # 8 (f32), 16 (bf16), 32 (int8/fp8) sublanes

    try:
        cap = int(pltpu.get_tpu_info().vmem_capacity_bytes)
    except Exception:
        cap = 64 << 20            # v7x per-TC physical VMEM: safe lower bound
    budget = (cap * 3) // 4       # headroom for compiler scratch / semaphores

    def need(t):
        # double-buffered in + out blocks, double-buffered E, misc slack
        return 2 * t * (in_row_bytes + out_row_bytes) + 2 * e_bytes + (2 << 20)

    if Rg <= sub:
        tbr = Rg                  # tiny input: one full-extent block
    else:
        total_out = Rg * out_row_bytes
        steps = max(2, _cdiv(total_out, target_out_bytes))
        if steps % 2:
            steps += 1            # even -> balanced split across 2 TCs (v7x)
        tbr = _cdiv(_cdiv(Rg, steps), sub) * sub
        # never collapse to a single full-extent block
        tbr = min(tbr, ((Rg - 1) // sub) * sub)
        tbr = max(tbr, sub)
        while tbr > sub and need(tbr) > budget:
            tbr -= sub

    grid = _cdiv(Rg, tbr)
    vmem_limit = int(min(budget, max(need(tbr), 32 << 20)))
    return tbr, grid, vmem_limit


def _make_kernel(G: int, W: int, s1: int, s2: int, use_matmul: bool):
    s2w = s2 * W

    if use_matmul:
        def kernel(x_ref, e_ref, o_ref):
            x = x_ref[...]
            # 0/1 selection -> exact in the I/O dtype; no f32 round-trip.
            up = jnp.dot(x, e_ref[...], preferred_element_type=o_ref.dtype)
            if G == 1 and s1 > 1:
                # Shrunk E: append the all-zero row block in-register so the
                # store is one full-width, lane-dense vst.
                pad = jnp.zeros((x.shape[0], (s1 - 1) * s2w), o_ref.dtype)
                o_ref[...] = jnp.concatenate([up, pad], axis=-1)
            else:
                o_ref[...] = up
        return kernel

    # s2 == 1: zero-insertion only along H -> pure data movement, no MXU.
    def kernel_copy(x_ref, o_ref):
        x = x_ref[...]
        zero = jnp.zeros((x.shape[0], (s1 - 1) * W), o_ref.dtype)
        pieces = []
        for g in range(G):
            pieces.append(x[:, g * W:(g + 1) * W])
            pieces.append(zero)
        o_ref[...] = jnp.concatenate(pieces, axis=-1)
    return kernel_copy


def lattice_upsample(x: jax.Array, s1: int, s2: int) -> jax.Array:
    """Zero-insertion upsample of an NCHW tensor by diag(s1, s2)."""
    N, C, H, W = x.shape
    if s1 == 1 and s2 == 1:
        return x

    dtype = x.dtype
    itemsize = jnp.dtype(dtype).itemsize
    R = N * C * H                 # one flat row per input scanline
    lane = s1 * s2 * W            # contiguous output elements per input row

    G = _choose_group(R, W, s1, s2, itemsize)
    Rg = R // G

    x2 = x.reshape(Rg, G * W)     # row-major -> layout-free reshape

    use_matmul = s2 > 1
    if use_matmul:
        if G == 1:
            # Shrunk selection matrix: only the live s2*W columns.
            E = (jnp.arange(s2 * W)[None, :]
                 == (s2 * jnp.arange(W))[:, None]).astype(dtype)
        else:
            # Block-diagonal selection over G grouped rows (small W only).
            p = jnp.arange(G * W)
            tgt = (p // W) * lane + s2 * (p % W)
            E = (jnp.arange(G * lane)[None, :] == tgt[:, None]).astype(dtype)
        e_bytes = int(E.size) * itemsize
    else:
        E = None
        e_bytes = 0

    tbr, nsteps, vmem_limit = _plan_row_block(
        Rg, G * W * itemsize, G * lane * itemsize, e_bytes, itemsize)

    kernel = _make_kernel(G, W, s1, s2, use_matmul)

    in_specs = [pl.BlockSpec((tbr, G * W), lambda i: (i, 0))]
    operands = [x2]
    if use_matmul:
        # Constant index_map: E is DMA'd once and reused every step.
        in_specs.append(pl.BlockSpec(E.shape, lambda i: (0, 0)))
        operands.append(E)

    out2 = pl.pallas_call(
        kernel,
        out_shape=jax.ShapeDtypeStruct((Rg, G * lane), dtype),
        grid_spec=pltpu.PrefetchScalarGridSpec(
            num_scalar_prefetch=0,
            grid=(nsteps,),
            in_specs=in_specs,
            out_specs=pl.BlockSpec((tbr, G * lane), lambda i: (i, 0)),
        ),
        compiler_params=pltpu.CompilerParams(
            dimension_semantics=("parallel",),
            vmem_limit_bytes=vmem_limit,
        ),
        # Report as data movement: the op is HBM-bandwidth bound.
        cost_estimate=pl.CostEstimate(
            flops=R * lane,
            transcendentals=0,
            bytes_accessed=(R * W + (int(E.size) if use_matmul else 0)
                            + R * lane) * itemsize,
        ),
    )(*operands)

    return out2.reshape(N, C, H * s1, W * s2)


if __name__ == "__main__":
    key = jax.random.PRNGKey(0)
    N, C, H, W = 2, 4, 16, 16
    s1, s2 = 2, 2  # upsampling_matrix = diag(2, 2)

    x = jax.random.normal(key, (N, C, H, W), dtype=jnp.float32)

    out = lattice_upsample(x, s1, s2)
    out = jax.block_until_ready(out)

    # Reference: plain-JAX zero-insertion upsample.
    ref = jnp.zeros((N, C, H * s1, W * s2), dtype=x.dtype)
    ref = ref.at[:, :, ::s1, ::s2].set(x)

    assert out.shape == (N, C, H * s1, W * s2), out.shape
    np.testing.assert_allclose(np.asarray(out), np.asarray(ref), rtol=0, atol=0)

    print("KERNEL_OK")
</pallas_src>

<mosaic_0001>
module attributes {stable_mosaic.version = 11 : i64} {
  func.func @kernel(%arg0: i32, %arg1: memref<32x32xf32, #tpu.memory_space<vmem>>, %arg2: memref<32x128xf32, #tpu.memory_space<vmem>>, %arg3: memref<32x128xf32, #tpu.memory_space<vmem>>) attributes {dimension_semantics = [#tpu.dimension_semantics<parallel>], iteration_bounds = array<i64: 2>, scalar_prefetch = 0 : i64, scratch_operands = 0 : i64, tpu.core_type = #tpu.core_type<tc>, window_params = [{transform_indices = @transform_0, window_bounds = array<i64: 32, 32>}, {pipeline_mode = #tpu.pipeline_mode<synchronous>, transform_indices = @transform_1, window_bounds = array<i64: 32, 128>}, {transform_indices = @transform_2, window_bounds = array<i64: 32, 128>}]} {
    %c0 = arith.constant 0 : index
    %c0_0 = arith.constant 0 : index
    %0 = vector.load %arg1[%c0, %c0_0] : memref<32x32xf32, #tpu.memory_space<vmem>>, vector<32x32xf32>
    %c0_1 = arith.constant 0 : index
    %c0_2 = arith.constant 0 : index
    %1 = vector.load %arg2[%c0_1, %c0_2] : memref<32x128xf32, #tpu.memory_space<vmem>>, vector<32x128xf32>
    %cst = arith.constant dense<0.000000e+00> : vector<32x128xf32>
    %2 = tpu.matmul %0, %1, %cst {dimension_numbers = #tpu.dot_dimension_numbers<[1], [0], [0], [1], [0, 0, 1, 1], [], []>} : vector<32x32xf32>, vector<32x128xf32>, vector<32x128xf32> -> vector<32x128xf32>
    %c0_3 = arith.constant 0 : index
    %c0_4 = arith.constant 0 : index
    %3 = vector.load %arg3[%c0_3, %c0_4] : memref<32x128xf32, #tpu.memory_space<vmem>>, vector<32x128xf32>
    tpu.vector_store %arg3[%c0_3, %c0_4], %2 {strides = array<i32>} : memref<32x128xf32, #tpu.memory_space<vmem>>, vector<32x128xf32>,
    return
  }
  func.func @transform_0(%arg0: i32) -> (i32, i32) {
    %c0_i32 = arith.constant 0 : i32
    %c0_i32_0 = arith.constant 0 : i32
    return %arg0, %c0_i32 : i32, i32
  }
  func.func @transform_1(%arg0: i32) -> (i32, i32) {
    %c0_i32 = arith.constant 0 : i32
    %c0_i32_0 = arith.constant 0 : i32
    %c0_i32_1 = arith.constant 0 : i32
    return %c0_i32, %c0_i32_0 : i32, i32
  }
  func.func @transform_2(%arg0: i32) -> (i32, i32) {
    %c0_i32 = arith.constant 0 : i32
    %c0_i32_0 = arith.constant 0 : i32
    return %arg0, %c0_i32 : i32, i32
  }
}

</mosaic_0001>

<bundles_post_ra>
// kernel: tpu_custom_call.1
= control target key start
LH: loop header
LB: loop body
LE: loop exit
PB: predicated region body
PF: predicated region fallthrough
CT: control target
= control target key end

     0   :  { %7 = vsyncpa [#allocation3], 0  ;;  %s612_s0 = inlined_call_operand.vmem [shape: f32[64,32], index: 0, kind: input, shape index: {}]   ;;  %s613_s1 = inlined_call_operand.vmem [shape: f32[32,128], index: 1, kind: input, shape index: {}]   ;;  %s614_s2 = inlined_call_operand.hbm [shape: f32[64,128], index: 2, kind: output, shape index: {}]  }
   0x1   :  { %9 = vsyncpa [#allocation3 + $0x1], 0  ;;  %s499_s9 = smov 0   ;;  %s501_s10 = smov 0  }
   0x2   :  { %s503_s11 = smov 0   ;;  %s505_s12 = smov 0  }
   0x3 LB: > { %s520_s13 = sadd.s32 4294967295, %s479_s12   ;;  %s331_s14 = sadd.s32 4294967294, %s479_s12   ;;  %s479_s12 = sphi %s505_s12, %s620_s12   ;;  %s475_s11 = sphi %s503_s11, %s619_s11   ;;  %s471_s10 = sphi %s501_s10, %s618_s10   ;;  %s467_s9 = sphi %s499_s9, %s617_s9  }
   0x4   : > { %s524_s15 = sadd.s32 1, %s479_s12   ;;  %s69_s16 = sadd.s32 1, %s475_s11 }
   0x5   : > { %s66_s17 = ssub.s32 %s479_s12, %s524_s15  ;;  %p79_p0 = scmp.ne.s32.totalorder %s475_s11, %s471_s10 }
   0x6   : > { %p67_p1 = scmp.eq.s32.totalorder %s66_s17, 0  ;;  %p80_p2 = scmp.eq.s32.totalorder %s520_s13, 1 }
   0x7   : > { %p85_p3 = scmp.ne.s32.totalorder %s471_s10, %s467_s9  ;;  %p86_p4 = scmp.eq.s32.totalorder %s331_s14, 1 }
   0x8   : > { %s535_s18 = scalar_select %p67_p1, %s475_s11, %s69_s16  }
   0x9   : > { %p537_p5 = por %p80_p2, %p79_p0  ;;  %p541_p6 = por %p86_p4, %p85_p3 }
   0xa   : > { %p334_p7 = scmp.ge.s32.totalorder %s479_s12, 1  ;;  %p116_p8 = scmp.lt.s32.totalorder %s479_s12, 3 }
   0xc   : > { %p117_p9 = pnand %p334_p7, %p116_p8 }
   0xd   : > { %s336_s25 = sshll.u32 (!%p117_p9), %s520_s13, 2  ;;  %s135_s6 = sand.u32 (!%p117_p9), 1, %s471_s10  }
   0xe   : > { %120 = sbr.rel (%p117_p9) target bundleno = 238 (0xee), region = 28  ;;  %p139_p10 = scmp.lt.s32.totalorder (!%p117_p9), %s336_s25, 7 }
   0xf   : > { %s335_s7 = sshll.u32 (!%p117_p9), %s135_s6, 5  ;;  %s347_s16 = sshll.u32 (!%p117_p9), %s520_s13, 9 }
  0x10   : > { %s137_s8 = scalar_lea.vmem (!%p117_p9), [#allocation2], %s335_s7  ;;  %s570_s22 = scalar_lea.hbm (!%p117_p9), %s614_s2, %s347_s16 }
  0x11   : > { %s269_s14 = sshll.u32 (!%p117_p9), %s137_s8, 4  ;;  %s572_s23 = scalar_lea.sflag (!%p117_p9), [#allocation3], %s135_s6  ;;  %s565_s14 = int_to_ptr.vmem [resolvable:$true] %s269_s14 }
  0x12   : > { %s419_s13 = scalar_lea.vmem (!%p117_p9), %s565_s14, 512  ;;  %s481_s24 = smov (!%p117_p9), [#allocation2]  }
  0x13   : > { %v152_v0 = vld [vmem:[%s613_s1 + $0x18] sm:$0xff]  ;;  %v151_v1 = vld [vmem:[%s613_s1 + $0x10] sm:$0xff]  ;;  %v150_v2 = vld [vmem:[%s613_s1 + $0x8] sm:$0xff]  ;;  %s622_s25 = smov (!%p139_p10, %s336_s25), 7  ;;  %vm153_vm0 = vcmask 261120   ;;  %p420_p11 = scmp.ne.s32.totalorder %s565_s14, %s419_s13 }
  0x14   : > { %356 = vmatprep.subr.mxu0 %v152_v0  ;;  %370 = vmatprep.subr.mxu1 %v152_v0  ;;  %v149_v3 = vld [vmem:[%s613_s1] sm:$0xff]  ;;  %s337_s30 = sshll.u32 %s622_s25, 3  ;;  %s423_s25 = sshll.u32 %s481_s24, 4  ;;  %s424_s25 = int_to_ptr.vmem [resolvable:$false] %s423_s25 }
  0x15   : > { %357 = vmatpush3.msra.mxu0 %v152_v0  ;;  %374 = vmatpush3.msra.mxu1 %v152_v0  ;;  %s142_s5 = scalar_lea.vmem %s612_s0, %s337_s30  ;;  %p421_p12 = pnand %p420_p11, %p537_p5 }
  0x16   : > { %358 = vmatprep.subr.mxu0 %v151_v1  ;;  %371 = vmatprep.subr.mxu1 %v151_v1  ;;  %v145_v4 = vld [vmem:[%s142_s5] sm:$0xff]  ;;  %v147_v5 = vld [vmem:[%s142_s5 + $0x10] sm:$0xff]  ;;  %v146_v6 = vld [vmem:[%s142_s5 + $0x8] sm:$0xff]  ;;  %s425_s26 = scalar_lea.vmem %s424_s25, 1024  ;;  %p426_p0 = scmp.lt.s32.totalorder %s565_s14, %s424_s25 }
  0x17   : > { %359 = vmatpush3.msra.mxu0 %v151_v1  ;;  %375 = vmatpush3.msra.mxu1 %v151_v1  ;;  %v148_v7 = vld [vmem:[%s142_s5 + $0x18] sm:$0xff]  ;;  %p422_p13 = pneg %p421_p12  ;;  %p427_p1 = scmp.lt.s32.totalorder %s425_s26, %s419_s13 }
  0x18   : > { %360 = vmatprep.subr.mxu0 %v150_v2  ;;  %372 = vmatprep.subr.mxu1 %v150_v2 }
  0x19   : > { %361 = vmatpush3.msra.mxu0 %v150_v2  ;;  %376 = vmatpush3.msra.mxu1 %v150_v2  ;;  %p428_p2 = por %p427_p1, %p426_p0 }
  0x1a   : > { %362 = vmatprep.subr.mxu0 %v149_v3  ;;  %373 = vmatprep.subr.mxu1 %v149_v3 }
  0x1b   : > { %363 = vmatpush3.msra.mxu0 %v149_v3  ;;  %377 = vmatpush3.msra.mxu1 %v149_v3  ;;  %p429_p3 = pnand %p428_p2, %p422_p13 }
  0x1c   : > { %364 = vmatprep.mubr.msk.f32.mxu0 %vm153_vm0, %v145_v4  ;;  %367 = vmatprep.mubr.msk.f32.mxu1 %vm153_vm0, %v147_v5 }
  0x1d   : > { %365 = vmatmul.mubr.msk.f32.vlgmr.msra.gmra.mxu0 %vm153_vm0, %v146_v6  ;;  %368 = vmatmul.mubr.msk.f32.vlgmr.msra.gmra.mxu1 %vm153_vm0, %v148_v7 }
  0xdd   : > { %v366_v8 = vpop.f32.mrf.mxu0  ;;  %v369_v9 = vpop.f32.mrf.mxu1 }
  0xde   : > { %252 = vst [vmem:[%s137_s8 + $0x8] sm:$0xff] %v366_v8  ;;  %254 = vst [vmem:[%s137_s8 + $0x18] sm:$0xff] %v369_v9 }
  0xdf   : > { %v232_v10 = vpop.f32.mrf.mxu0  ;;  %v242_v11 = vpop.f32.mrf.mxu1 }
  0xe0   : > { %251 = vst [vmem:[%s137_s8] sm:$0xff] %v232_v10  ;;  %253 = vst [vmem:[%s137_s8 + $0x10] sm:$0xff] %v242_v11 }
  0xe1   : > { %432 = shalt.err (!%p429_p3)
}
  0xe2   : > { %s433_s27 = scalar_lea.hbm %s570_s22, 512  ;;  %s437_s30 = scalar_lea.hbm %s614_s2, 1024 }
  0xe3   : > { %p434_p4 = scmp.ne.s32.totalorder %s570_s22, %s433_s27  ;;  %p438_p9 = scmp.lt.s32.totalorder %s570_s22, %s614_s2 }
  0xe4   : > { %p439_p10 = scmp.lt.s32.totalorder %s437_s30, %s433_s27 }
  0xe5   : > { %p435_p7 = pnand %p434_p4, %p537_p5 }
  0xe6   : > { %p440_p11 = por %p439_p10, %p438_p9 }
  0xe7   : > { %p436_p8 = pneg %p435_p7 }
  0xe9   : > { %p441_p12 = pnand %p440_p11, %p436_p8 }
  0xeb   : > { %444 = shalt.err (!%p441_p12)
}
  0xec   : > { %s482_s5 = smov 128   ;;  %s483_s6 = smov 8  }
  0xed   : > { %378 = dma.vmem_to_hbm [thread:$0]  (%p537_p5), %s565_s14, 512, %s570_s22, %s572_s23, %s482_s5, %s482_s5, %s483_s6  }
  0xee PF: > { %p384_p13 = scmp.ge.s32.totalorder %s479_s12, 2  ;;  %s284_s7 = sand.u32 1, %s467_s9  }
  0xef   : > { %s285_s8 = scalar_lea.sflag [#allocation3], %s284_s7 }
  0xf0   : > { %p381_p0 = pnand %p384_p13, %p541_p6 }
  0xf2   : > { %p382_p1 = pneg %p381_p0 }
  0xf4   : > { %462 = dma.done.wait (%p382_p1), %s285_s8, 512  }
  0xf5   : > { %464 = vsyncadd (%p382_p1), %s285_s8, 4294966784  ;;  %p12_p2 = scmp.ge.s32.totalorder %s524_s15, 4   ;;  %s617_s9 = smov %s471_s10 }
  0xf6   : > { %s618_s10 = smov %s475_s11  ;;  %s619_s11 = smov %s535_s18 }
  0xf7   : > { %s620_s12 = smov %s524_s15  ;;  %14 = sbr.rel (!%p12_p2) target bundleno = 3 (0x3), region = 63 }
  0xfc   :  { %290 = vsyncpa [#allocation3], 1 }
  0xfd   :  { %292 = vsyncpa [#allocation3 + $0x1], 1 }

</bundles_post_ra>
